<compile_context>
chip_gen: v7x
topology: tpu7x:2x2x1
jax: 0.10.0
libtpu: 0.0.40
codegen_flags: <defaults>
</compile_context>

<pallas_src>
import jax
import jax.numpy as jnp
from jax.experimental import pallas as pl
from jax.experimental.pallas import tpu as pltpu

_NEG_SENTINEL = -3.0e38   # finite (not -inf) so sentinel-vs-sentinel never makes NaN
_POS_SENTINEL = 3.0e38


def _pairwise_hinge_sum_kernel(pred_col_ref, pred_row_ref, out_ref, acc_ref):
    """Accumulates sum_{a,b} max(0, pred_col[a] - pred_row[b]) over all tiles."""
    i = pl.program_id(0)
    j = pl.program_id(1)

    @pl.when((i == 0) & (j == 0))
    def _init():
        acc_ref[...] = jnp.zeros_like(acc_ref)

    # (TM, 1) - (1, TN) broadcasts to (TM, TN).  Margin is pre-folded into
    # pred_col and invalid rows/cols carry +-3e38 sentinels, so masked /
    # padded pairs contribute exactly 0 after the max.  Pure VALU work:
    # one sub + one max + one accumulate-add per element.
    hinge = jnp.maximum(pred_col_ref[...] - pred_row_ref[...], 0.0)
    acc_ref[...] += hinge

    @pl.when((i == pl.num_programs(0) - 1) & (j == pl.num_programs(1) - 1))
    def _finalize():
        # Single cross-lane/sublane reduction, amortized over the whole grid.
        out_ref[0, 0] = jnp.sum(acc_ref[...])


def _round_up(x, m):
    return ((x + m - 1) // m) * m


def pairwise_margin_ranking_loss(prediction, label, margin=0.0,
                                 tile_m=256, tile_n=512):
    """prediction, label: (B, 1) (or (B,)) arrays. Returns scalar mean loss."""
    B = prediction.shape[0]
    pred = prediction.reshape(B).astype(jnp.float32)
    lab = label.reshape(B).astype(jnp.float32)

    # Sentinel pre-masking (wrapper side).  Margin folded into the column
    # operand so the kernel body is just sub + max.
    col = jnp.where(lab == 0.0, pred + jnp.float32(margin), _NEG_SENTINEL)
    row = jnp.where(lab == 1.0, pred, _POS_SENTINEL)

    tm = min(tile_m, _round_up(B, 8))      # sublane-aligned row tile
    tn = min(tile_n, _round_up(B, 128))    # lane-aligned column tile
    bp_r = _round_up(B, tm)
    bp_c = _round_up(B, tn)

    pred_col = jnp.pad(col, (0, bp_r - B),
                       constant_values=_NEG_SENTINEL).reshape(bp_r, 1)
    pred_row = jnp.pad(row, (0, bp_c - B),
                       constant_values=_POS_SENTINEL).reshape(1, bp_c)

    grid = (bp_r // tm, bp_c // tn)

    total = pl.pallas_call(
        _pairwise_hinge_sum_kernel,
        out_shape=jax.ShapeDtypeStruct((1, 1), jnp.float32),
        grid=grid,
        in_specs=[
            pl.BlockSpec((tm, 1), lambda i, j: (i, 0)),    # class-0 operand (column)
            pl.BlockSpec((1, tn), lambda i, j: (0, j)),    # class-1 operand (row)
        ],
        out_specs=pl.BlockSpec(memory_space=pltpu.MemorySpace.SMEM),
        scratch_shapes=[pltpu.VMEM((tm, tn), jnp.float32)],
        compiler_params=pltpu.CompilerParams(
            # Both grid axes feed the single shared accumulator -> reductions.
            dimension_semantics=("arbitrary", "arbitrary")),
    )(pred_col, pred_row)[0, 0]

    # 'mean' reduction applied wrapper-side (also removes the label streams and
    # the in-kernel divide).  NaN if a class is absent -- matches PyTorch's
    # mean over an empty masked_select.
    n0 = jnp.sum(lab == 0.0).astype(jnp.float32)
    n1 = jnp.sum(lab == 1.0).astype(jnp.float32)
    return total / (n0 * n1)
    # TODO(synk): reduction='sum'/'none' variants not implemented (module default is 'mean').


def _reference(prediction, label, margin=0.0):
    """Pure-JAX reference mirroring the PyTorch masked_select construction."""
    pred = jnp.asarray(prediction).reshape(-1)
    lab = jnp.asarray(label).reshape(-1)
    p0 = pred[lab == 0.0]
    p1 = pred[lab == 1.0]
    pairs = jnp.maximum(p0[None, :] - p1[:, None] + margin, 0.0)
    return jnp.mean(pairs)


if __name__ == "__main__":
    key = jax.random.PRNGKey(0)
    k1, k2 = jax.random.split(key)

    # Small single-tile test (B=8, matches the Bx1 module convention).
    B = 8
    prediction = jax.random.uniform(k1, (B, 1), dtype=jnp.float32)
    label = jnp.array([0, 1, 0, 1, 1, 0, 1, 0], dtype=jnp.float32).reshape(B, 1)
    loss = jax.block_until_ready(
        pairwise_margin_ranking_loss(prediction, label, margin=0.0))
    ref = _reference(prediction, label, margin=0.0)
    assert jnp.allclose(loss, ref, atol=1e-5, rtol=1e-5), (loss, ref)

    # Multi-tile test exercising the 2-D grid + accumulator path (nonzero margin).
    B2 = 300
    p2 = jax.random.uniform(k2, (B2, 1), dtype=jnp.float32)
    l2 = (jnp.arange(B2) % 2).astype(jnp.float32).reshape(B2, 1)
    loss2 = jax.block_until_ready(
        pairwise_margin_ranking_loss(p2, l2, margin=0.1))
    ref2 = _reference(p2, l2, margin=0.1)
    assert jnp.allclose(loss2, ref2, atol=1e-5, rtol=1e-5), (loss2, ref2)

    print("KERNEL_OK")
</pallas_src>

<mosaic_0001>
module attributes {stable_mosaic.version = 11 : i64} {
  func.func @_pairwise_hinge_sum_kernel(%arg0: i32, %arg1: i32, %arg2: memref<8x1xf32, #tpu.memory_space<vmem>>, %arg3: memref<1x128xf32, #tpu.memory_space<vmem>>, %arg4: memref<1x1xf32, #tpu.memory_space<smem>>, %arg5: memref<8x128xf32, #tpu.memory_space<vmem>>) attributes {dimension_semantics = [#tpu.dimension_semantics<arbitrary>, #tpu.dimension_semantics<arbitrary>], iteration_bounds = array<i64: 1, 1>, scalar_prefetch = 0 : i64, scratch_operands = 1 : i64, tpu.core_type = #tpu.core_type<tc>, window_params = [{transform_indices = @transform_0, window_bounds = array<i64: 8, 1>}, {transform_indices = @transform_1, window_bounds = array<i64: 1, 128>}, {transform_indices = @transform_2, window_bounds = array<i64: 1, 1>}]} {
    %c0_i32 = arith.constant 0 : i32
    %0 = arith.cmpi eq, %arg0, %c0_i32 : i32
    %c0_i32_0 = arith.constant 0 : i32
    %1 = arith.cmpi eq, %arg1, %c0_i32_0 : i32
    %2 = arith.andi %0, %1 : i1
    %3 = arith.extui %2 : i1 to i32
    %c0_i32_1 = arith.constant 0 : i32
    %4 = arith.cmpi ne, %3, %c0_i32_1 : i32
    scf.if %4 {
      %cst_12 = arith.constant 0.000000e+00 : f32
      %20 = vector.broadcast %cst_12 : f32 to vector<8x128xf32>
      %c0_13 = arith.constant 0 : index
      %c0_14 = arith.constant 0 : index
      %21 = vector.load %arg5[%c0_13, %c0_14] : memref<8x128xf32, #tpu.memory_space<vmem>>, vector<8x128xf32>
      tpu.vector_store %arg5[%c0_13, %c0_14], %20 {strides = array<i32>} : memref<8x128xf32, #tpu.memory_space<vmem>>, vector<8x128xf32>,
    } else {
    }
    %c0 = arith.constant 0 : index
    %c0_2 = arith.constant 0 : index
    %5 = vector.load %arg2[%c0, %c0_2] : memref<8x1xf32, #tpu.memory_space<vmem>>, vector<8x1xf32>
    %c0_3 = arith.constant 0 : index
    %c0_4 = arith.constant 0 : index
    %6 = vector.load %arg3[%c0_3, %c0_4] : memref<1x128xf32, #tpu.memory_space<vmem>>, vector<1x128xf32>
    %7 = vector.broadcast %5 : vector<8x1xf32> to vector<8x128xf32>
    %8 = vector.broadcast %6 : vector<1x128xf32> to vector<8x128xf32>
    %9 = arith.subf %7, %8 : vector<8x128xf32>
    %cst = arith.constant 0.000000e+00 : f32
    %10 = vector.broadcast %cst : f32 to vector<8x128xf32>
    %11 = arith.maximumf %9, %10 : vector<8x128xf32>
    %c0_5 = arith.constant 0 : index
    %c0_6 = arith.constant 0 : index
    %12 = vector.load %arg5[%c0_5, %c0_6] : memref<8x128xf32, #tpu.memory_space<vmem>>, vector<8x128xf32>
    %13 = arith.addf %12, %11 : vector<8x128xf32>
    %c0_7 = arith.constant 0 : index
    %c0_8 = arith.constant 0 : index
    %14 = vector.load %arg5[%c0_7, %c0_8] : memref<8x128xf32, #tpu.memory_space<vmem>>, vector<8x128xf32>
    tpu.vector_store %arg5[%c0_7, %c0_8], %13 {strides = array<i32>} : memref<8x128xf32, #tpu.memory_space<vmem>>, vector<8x128xf32>,
    %c0_i32_9 = arith.constant 0 : i32
    %15 = arith.cmpi eq, %arg0, %c0_i32_9 : i32
    %c0_i32_10 = arith.constant 0 : i32
    %16 = arith.cmpi eq, %arg1, %c0_i32_10 : i32
    %17 = arith.andi %15, %16 : i1
    %18 = arith.extui %17 : i1 to i32
    %c0_i32_11 = arith.constant 0 : i32
    %19 = arith.cmpi ne, %18, %c0_i32_11 : i32
    scf.if %19 {
      %c0_12 = arith.constant 0 : index
      %c0_13 = arith.constant 0 : index
      %20 = vector.load %arg5[%c0_12, %c0_13] : memref<8x128xf32, #tpu.memory_space<vmem>>, vector<8x128xf32>
      %21 = vector.shape_cast %20 : vector<8x128xf32> to vector<1x8x128xf32>
      %cst_14 = arith.constant dense<0.000000e+00> : vector<1xf32>
      %22 = vector.multi_reduction <add>, %21, %cst_14 [1, 2] : vector<1x8x128xf32> to vector<1xf32>
      %23 = vector.shape_cast %22 : vector<1xf32> to vector<1x1x1xf32>
      %24 = vector.extract %23[0, 0, 0] : f32 from vector<1x1x1xf32>
      %c0_15 = arith.constant 0 : index
      %c0_16 = arith.constant 0 : index
      %25 = memref.load %arg4[%c0_15, %c0_16] : memref<1x1xf32, #tpu.memory_space<smem>>
      memref.store %24, %arg4[%c0_15, %c0_16] : memref<1x1xf32, #tpu.memory_space<smem>>
    } else {
    }
    return
  }
  func.func @transform_0(%arg0: i32, %arg1: i32) -> (i32, i32) {
    %c0_i32 = arith.constant 0 : i32
    %c0_i32_0 = arith.constant 0 : i32
    return %arg0, %c0_i32 : i32, i32
  }
  func.func @transform_1(%arg0: i32, %arg1: i32) -> (i32, i32) {
    %c0_i32 = arith.constant 0 : i32
    %c0_i32_0 = arith.constant 0 : i32
    return %c0_i32, %arg1 : i32, i32
  }
  func.func @transform_2(%arg0: i32, %arg1: i32) -> (i32, i32) {
    %c0_i32 = arith.constant 0 : i32
    %c0_i32_0 = arith.constant 0 : i32
    %c0_i32_1 = arith.constant 0 : i32
    return %c0_i32, %c0_i32_0 : i32, i32
  }
}

</mosaic_0001>

<bundles_post_ra>
// kernel: tpu_custom_call.1
= control target key start
LH: loop header
LB: loop body
LE: loop exit
PB: predicated region body
PF: predicated region fallthrough
CT: control target
= control target key end

     0   :  { %s117_s0 = inlined_call_operand.vmem [shape: f32[8,1], index: 0, kind: input, shape index: {}]   ;;  %s118_s1 = inlined_call_operand.vmem [shape: f32[1,128], index: 1, kind: input, shape index: {}]   ;;  %s119_s2 = inlined_call_operand.hbm [shape: f32[1,1], index: 2, kind: output, shape index: {}]  }
   0x1   :  { %v19_v0 = vld [vmem:[%s117_s0] sm:$0xff] }
   0x2   :  { %7 = vsyncpa [#allocation4], 0  ;;  %v82_v1 = vmov 0   ;;  %v64_v2 = vld [vmem:[%s118_s1] ss:$0 sm:$0xff]  ;;  %s70_s15 = scalar_lea.hbm %s119_s2, 16 }
   0x3   :  { %69 = vset.pattern.permute.xlu0 %v82_v1  ;;  %p71_p0 = scmp.ne.s32.totalorder %s119_s2, %s70_s15  ;;  %p74_p1 = scmp.lt.u32.totalorder %s70_s15, %s119_s2 }
   0x4   :  { %23 = vperm.xlu0 %69, %v19_v0  }
   0x5   :  { %p76_p2 = pnand %p74_p1, %p71_p0 }
  0x83   :  { %v24_v3 = vpop.permute.xlu0 %23 }
  0x84   :  { %v32_v4 = vsub.f32 %v24_v3, %v64_v2 }
  0x86   :  { %v33_v5 = vmax.f32 %v32_v4, 0.0 }
  0x88   :  { %40 = vadd.xlane.f32.xlu0 %v33_v5 }
 0x115   :  { %v41_v6 = vpop.xlane.xlu0 %40 }
 0x116   :  { %v42_v7 = vrot.slane %v41_v6, 4 }
 0x118   :  { %v43_v8 = vadd.f32 %v42_v7, %v41_v6 }
 0x11a   :  { %v44_v9 = vrot.slane %v43_v8, 2 }
 0x11c   :  { %v45_v10 = vadd.f32 %v44_v9, %v43_v8 }
 0x11e   :  { %v46_v11 = vrot.slane %v45_v10, 1 }
 0x120   :  { %v47_v12 = vadd.f32 %v46_v11, %v45_v10 }
 0x122   :  { %65 = vpush %v47_v12 }
 0x153   :  { %s66_s0 = spop %65 }
 0x154   :  { %50 = sst [smem:[#allocation3]] %s66_s0 }
 0x155   :  { %79 = shalt.err (!%p76_p2)
}
 0x156   :  { %s83_s19 = smov [#allocation3]  }
 0x157   :  { %58 = dma.smem_to_hbm %s83_s19, 16, %s119_s2, [#allocation4]  }
 0x158   :  { %80 = dma.done.wait [#allocation4], 16  }
 0x159   :  { %81 = vsyncadd [#allocation4], 4294967280 }
 0x15a   :  { %62 = sfence }
 0x15b   :  { %63 = vsyncpa [#allocation4], 1 }

</bundles_post_ra>
